<compile_context>
chip_gen: v7x
topology: tpu7x:2x2x1
jax: 0.10.0
libtpu: 0.0.40
codegen_flags: <defaults>
</compile_context>

<pallas_src>
import jax
import jax.numpy as jnp
from jax.experimental import pallas as pl
from jax.experimental.pallas import tpu as pltpu

_LANES = 128
_TARGET_BLOCK_BYTES = 4 << 20  # ~4 MiB payload per block (per buffer).


def _copy_kernel(src_ref, dst_ref):
    # Straight VMEM tile copy: dst = src.
    dst_ref[...] = src_ref[...]


def _row_tile(rows: int, row_bytes: int) -> int:
    """Fixed row tile: ~4 MiB per block, multiple of 8, clamped to the array."""
    te = max(8, (_TARGET_BLOCK_BYTES // max(row_bytes, 1)) // 8 * 8)
    rows_up = -(-rows // 8) * 8  # round rows up to a multiple of 8
    return min(te, rows_up)


def _materialized_copy(edge_attr):
    """Pallas copy kernel producing a distinct, materialized [E, D] buffer."""
    E, D = edge_attr.shape
    total = E * D
    if total == 0:
        return edge_attr

    itemsize = jnp.dtype(edge_attr.dtype).itemsize
    compiler_params = pltpu.CompilerParams(
        dimension_semantics=("parallel",),
        vmem_limit_bytes=64 << 20,
    )

    if total % _LANES == 0:
        # Lane-dense view: last dim == 128 -> unmasked full-width vector stores.
        rows = total // _LANES
        flat = edge_attr.reshape(rows, _LANES)
        te = _row_tile(rows, _LANES * itemsize)
        out_flat = pl.pallas_call(
            _copy_kernel,
            out_shape=jax.ShapeDtypeStruct((rows, _LANES), edge_attr.dtype),
            grid=(pl.cdiv(rows, te),),
            in_specs=[pl.BlockSpec((te, _LANES), lambda i: (i, 0))],
            out_specs=pl.BlockSpec((te, _LANES), lambda i: (i, 0)),
            compiler_params=compiler_params,
        )(flat)
        return out_flat.reshape(E, D)

    # Fallback when E*D is not a multiple of 128: tile the row (edge) axis
    # with a multiple-of-8 block and keep D as the full-extent last dim
    # (legal regardless of D).  Masked partial stores when D < 128 are the
    # unavoidable cost of this shape; pipelining is preserved.
    te_rows = _row_tile(E, D * itemsize)
    return pl.pallas_call(
        _copy_kernel,
        out_shape=jax.ShapeDtypeStruct((E, D), edge_attr.dtype),
        grid=(pl.cdiv(E, te_rows),),
        in_specs=[pl.BlockSpec((te_rows, D), lambda i: (i, 0))],
        out_specs=pl.BlockSpec((te_rows, D), lambda i: (i, 0)),
        compiler_params=compiler_params,
    )(edge_attr)


def edge_identity(x, edge_index, edge_attr, *, materialize=False):
    """Pallas/JAX equivalent of Edge_indentity.forward(x, edge_index, edge_attr).

    Default path: return `edge_attr` directly (no kernel, no HBM traffic),
    matching the PyTorch identity semantics exactly.  Set `materialize=True`
    to force a tiled Pallas copy into a fresh buffer.
    """
    del x, edge_index  # unused by the module's forward, kept for API parity.
    if not materialize:
        return edge_attr
    return _materialized_copy(edge_attr)


if __name__ == "__main__":
    key = jax.random.PRNGKey(0)
    k_x, k_attr, k_idx, k_attr2 = jax.random.split(key, 4)

    # Small graph: 8 nodes with 32 features, 16 edges with 32 edge features.
    num_nodes, node_feat = 8, 32
    num_edges, edge_feat = 16, 32

    x = jax.random.normal(k_x, (num_nodes, node_feat), dtype=jnp.float32)
    edge_index = jax.random.randint(
        k_idx, (2, num_edges), 0, num_nodes, dtype=jnp.int32
    )
    edge_attr = jax.random.normal(k_attr, (num_edges, edge_feat), dtype=jnp.float32)

    # Fast identity path (the true module equivalent): zero-cost alias.
    out_fast = edge_identity(x, edge_index, edge_attr)
    out_fast = jax.block_until_ready(out_fast)

    # Materialized Pallas copy path (lane-dense branch: 16*32 % 128 == 0).
    out_copy = edge_identity(x, edge_index, edge_attr, materialize=True)
    out_copy = jax.block_until_ready(out_copy)

    # Exercise the ragged fallback branch (10*24 = 240, not a multiple of 128).
    edge_attr_odd = jax.random.normal(k_attr2, (10, 24), dtype=jnp.float32)
    out_copy_odd = edge_identity(x, edge_index, edge_attr_odd, materialize=True)
    out_copy_odd = jax.block_until_ready(out_copy_odd)

    assert out_fast.shape == edge_attr.shape and out_fast.dtype == edge_attr.dtype
    assert out_copy.shape == edge_attr.shape and out_copy.dtype == edge_attr.dtype
    assert out_copy_odd.shape == edge_attr_odd.shape
    assert bool(jnp.all(out_fast == edge_attr))
    assert bool(jnp.all(out_copy == edge_attr))
    assert bool(jnp.all(out_copy_odd == edge_attr_odd))
    print("KERNEL_OK")
</pallas_src>

<mosaic_0001>
module attributes {stable_mosaic.version = 11 : i64} {
  func.func @_copy_kernel(%arg0: i32, %arg1: memref<8x128xf32, #tpu.memory_space<vmem>>, %arg2: memref<8x128xf32, #tpu.memory_space<vmem>>) attributes {dimension_semantics = [#tpu.dimension_semantics<parallel>], iteration_bounds = array<i64: 1>, scalar_prefetch = 0 : i64, scratch_operands = 0 : i64, tpu.core_type = #tpu.core_type<tc>, window_params = [{transform_indices = @transform_0, window_bounds = array<i64: 8, 128>}, {transform_indices = @transform_1, window_bounds = array<i64: 8, 128>}]} {
    %c0 = arith.constant 0 : index
    %c0_0 = arith.constant 0 : index
    %0 = vector.load %arg1[%c0, %c0_0] : memref<8x128xf32, #tpu.memory_space<vmem>>, vector<8x128xf32>
    %c0_1 = arith.constant 0 : index
    %c0_2 = arith.constant 0 : index
    %1 = vector.load %arg2[%c0_1, %c0_2] : memref<8x128xf32, #tpu.memory_space<vmem>>, vector<8x128xf32>
    tpu.vector_store %arg2[%c0_1, %c0_2], %0 {strides = array<i32>} : memref<8x128xf32, #tpu.memory_space<vmem>>, vector<8x128xf32>,
    return
  }
  func.func @transform_0(%arg0: i32) -> (i32, i32) {
    %c0_i32 = arith.constant 0 : i32
    %c0_i32_0 = arith.constant 0 : i32
    return %arg0, %c0_i32 : i32, i32
  }
  func.func @transform_1(%arg0: i32) -> (i32, i32) {
    %c0_i32 = arith.constant 0 : i32
    %c0_i32_0 = arith.constant 0 : i32
    return %arg0, %c0_i32 : i32, i32
  }
}

</mosaic_0001>

<bundles_post_ra>
// kernel: tpu_custom_call.1
= control target key start
LH: loop header
LB: loop body
LE: loop exit
PB: predicated region body
PF: predicated region fallthrough
CT: control target
= control target key end

     0   :  { %6 = vsyncpa [#allocation3], 0  ;;  %s132_s0 = inlined_call_operand.hbm [shape: f32[4,128], index: 0, kind: input, shape index: {}]   ;;  %s133_s1 = inlined_call_operand.hbm [shape: f32[4,128], index: 1, kind: output, shape index: {}]  }
   0x1   :  { %7 = vsyncpa [#allocation4], 0 }
   0x2   :  { %12 = vsyncadd [#allocation3], 64  ;;  %s94_s6 = smov [#allocation2]   ;;  %s46_s10 = scalar_lea.hbm %s132_s0, 64 }
   0x3   :  { %s13_s7 = sshll.u32 %s94_s6, 4  ;;  %p47_p0 = scmp.ne.s32.totalorder %s132_s0, %s46_s10  ;;  %s14_s7 = int_to_ptr.vmem [resolvable:$true] %s13_s7 }
   0x4   :  { %p50_p1 = scmp.lt.u32.totalorder %s46_s10, %s132_s0 }
   0x6   :  { %p52_p2 = pnand %p50_p1, %p47_p0 }
   0x8   :  { %55 = shalt.err (!%p52_p2)
}
   0x9   :  { %s56_s15 = scalar_lea.vmem %s14_s7, 64  ;;  %s60_s16 = scalar_lea.vmem %s14_s7, 128 }
   0xa   :  { %p57_p3 = scmp.ne.s32.totalorder %s14_s7, %s56_s15  ;;  %p61_p4 = scmp.lt.s32.totalorder %s14_s7, %s14_s7 }
   0xb   :  { %p62_p5 = scmp.lt.s32.totalorder %s60_s16, %s56_s15 }
   0xd   :  { %p63_p6 = por %p62_p5, %p61_p4 }
   0xf   :  { %p64_p7 = pnand %p63_p6, %p57_p3 }
  0x11   :  { %67 = shalt.err (!%p64_p7)
}
  0x12   :  { %s95_s17 = smov 64   ;;  %s96_s18 = smov 4  }
  0x13   :  { %19 = dma.hbm_to_vmem [thread:$0]  %s132_s0, 64, %s14_s7, [#allocation3], %s95_s17, %s95_s17, %s96_s18  }
  0x14   :  { %90 = dma.done.wait [#allocation3], 128  }
  0x15   :  { %91 = vsyncadd [#allocation3], 4294967168  ;;  %v23_v0 = vld [vmem:[#allocation2] sm:$0xff] }
  0x16   :  { %24 = vst [vmem:[#allocation5] sm:$0xff] %v23_v0 }
  0x17   :  { %29 = vsyncadd [#allocation4], 64  ;;  %s97_s21 = smov [#allocation5]  }
  0x18   :  { %s30_s22 = sshll.u32 %s97_s21, 4  ;;  %s31_s22 = int_to_ptr.vmem [resolvable:$true] %s30_s22 }
  0x19   :  { %s68_s23 = scalar_lea.vmem %s31_s22, 64  ;;  %s72_s24 = scalar_lea.vmem %s31_s22, 128 }
  0x1a   :  { %p69_p8 = scmp.ne.s32.totalorder %s31_s22, %s68_s23  ;;  %p73_p9 = scmp.lt.s32.totalorder %s31_s22, %s31_s22 }
  0x1b   :  { %p74_p10 = scmp.lt.s32.totalorder %s72_s24, %s68_s23 }
  0x1d   :  { %p75_p11 = por %p74_p10, %p73_p9 }
  0x1f   :  { %p76_p12 = pnand %p75_p11, %p69_p8 }
  0x21   :  { %79 = shalt.err (!%p76_p12)
}
  0x22   :  { %s80_s0 = scalar_lea.hbm %s133_s1, 64 }
  0x23   :  { %p81_p13 = scmp.ne.s32.totalorder %s133_s1, %s80_s0  ;;  %p84_p0 = scmp.lt.u32.totalorder %s80_s0, %s133_s1 }
  0x25   :  { %p86_p1 = pnand %p84_p0, %p81_p13 }
  0x27   :  { %89 = shalt.err (!%p86_p1)
}
  0x28   :  { %36 = dma.vmem_to_hbm [thread:$0]  %s31_s22, 64, %s133_s1, [#allocation4], %s95_s17, %s95_s17, %s96_s18  }
  0x29   :  { %92 = dma.done.wait [#allocation4], 128  }
  0x2a   :  { %93 = vsyncadd [#allocation4], 4294967168 }
  0x2b   :  { %40 = vsyncpa [#allocation3], 1 }
  0x2c   :  { %41 = vsyncpa [#allocation4], 1 }

</bundles_post_ra>
